<compile_context>
chip_gen: v7x
topology: tpu7x:2x2x1
jax: 0.10.0
libtpu: 0.0.40
codegen_flags: <defaults>
</compile_context>

<pallas_src>
import functools
import math

import jax
import jax.numpy as jnp
from jax import lax
from jax.experimental import pallas as pl
from jax.experimental.pallas import tpu as pltpu

_MIB = 1024 * 1024
_VMEM_LIMIT_CACHE = None


def _vmem_limit_bytes():
    """Generation-aware VMEM limit: ~40 MiB on 64-MiB parts, ~104 MiB on 128-MiB parts."""
    global _VMEM_LIMIT_CACHE
    if _VMEM_LIMIT_CACHE is None:
        try:
            cap = int(pltpu.get_tpu_info().vmem_capacity_bytes)
        except Exception:  # pragma: no cover - conservative default (v7x-sized)
            cap = 64 * _MIB
        _VMEM_LIMIT_CACHE = max(32 * _MIB, min(cap - 24 * _MIB, 110 * _MIB))
    return _VMEM_LIMIT_CACHE


def _pick_tile(dim, preferred, unit):
    """Largest power-of-two multiple of `unit` <= preferred dividing dim, else full dim."""
    t = preferred
    while t >= unit:
        if dim % t == 0 and dim >= t:
            return t
        t //= 2
    return dim


# --------------------------- tiled linear (x @ w + b) ------------------------


def _matmul_bias_kernel(x_ref, w_ref, b_ref, o_ref, acc_ref):
    @pl.when(pl.program_id(2) == 0)
    def _():
        acc_ref[...] = jnp.zeros_like(acc_ref)

    # operands arrive in bf16 from HBM; f32 accumulation on the MXU
    acc_ref[...] += jnp.dot(x_ref[...], w_ref[...],
                            preferred_element_type=jnp.float32)

    @pl.when(pl.program_id(2) == pl.num_programs(2) - 1)
    def _():
        o_ref[...] = (acc_ref[...] + b_ref[...].astype(jnp.float32)
                      ).astype(o_ref.dtype)


def linear(x, w, b, *, out_dtype=jnp.float32, tm=512, tn=512, tk=512):
    """x: (M, K), w: (K, N) (bf16 recommended), b: (N,) f32 -> (M, N) out_dtype."""
    M, K = x.shape
    N = w.shape[1]
    tm = _pick_tile(M, tm, 8)     # sublane dim: multiple of 8 or full
    tn = _pick_tile(N, tn, 128)   # lane dim: multiple of 128 or full
    tk = _pick_tile(K, tk, 128)
    return pl.pallas_call(
        _matmul_bias_kernel,
        grid=(M // tm, N // tn, K // tk),
        out_shape=jax.ShapeDtypeStruct((M, N), out_dtype),
        in_specs=[
            pl.BlockSpec((tm, tk), lambda i, j, k: (i, k)),
            pl.BlockSpec((tk, tn), lambda i, j, k: (k, j)),
            pl.BlockSpec((1, tn), lambda i, j, k: (0, j)),
        ],
        out_specs=pl.BlockSpec((tm, tn), lambda i, j, k: (i, j)),
        scratch_shapes=[pltpu.VMEM((tm, tn), jnp.float32)],
        compiler_params=pltpu.CompilerParams(
            dimension_semantics=("parallel", "parallel", "arbitrary"),
            vmem_limit_bytes=_vmem_limit_bytes(),
        ),
    )(x, w, b.reshape(1, N).astype(jnp.float32))


# ------------------------------ attention core -------------------------------


def _attention_kernel(q_ref, kT_ref, v_ref, rkT_ref, rv_ref, attn_ref, ctx_ref,
                      *, inv_scale, max_rel, q_block, use_gather):
    f32, bf16 = jnp.float32, jnp.bfloat16
    T = 2 * max_rel + 1

    q = q_ref[...]        # (tq, Dh) bf16
    kT = kT_ref[...]      # (Dh, S)  bf16
    v = v_ref[...]        # (S, Dh)  bf16
    rkT = rkT_ref[...]    # (Dh, TP) bf16, columns >= T are zero
    rv = rv_ref[...]      # (TP, Dh) bf16, rows    >= T are zero

    tq, Dh = q.shape
    S = kT.shape[1]
    TP = rv.shape[0]

    q_off = pl.program_id(1) * q_block

    # ---- scores --------------------------------------------------------------
    # content-content scores (MXU), K already (K,N)-oriented
    attn1 = jnp.dot(q, kT, preferred_element_type=f32)                  # (tq, S)
    # content-position scores per relative bucket (MXU), lane-padded to TP=128
    qs = jnp.dot(q, rkT, preferred_element_type=f32)                    # (tq, TP)

    if use_gather:
        # skew (tq, TP) bucket scores onto (tq, S) with one lane-gather per
        # 128-column block (equal-shape take_along_axis -> tpu.dynamic_gather)
        row_b = lax.broadcasted_iota(jnp.int32, (tq, TP), 0) + q_off
        lane_b = lax.broadcasted_iota(jnp.int32, (tq, TP), 1)
        blocks = []
        for cb in range(S // TP):
            didx = jnp.clip(lane_b + cb * TP - row_b, -max_rel, max_rel) + max_rel
            blocks.append(jnp.take_along_axis(qs, didx, axis=-1,
                                              mode="promise_in_bounds"))
        attn2 = blocks[0] if len(blocks) == 1 else jnp.concatenate(blocks, axis=-1)
    else:
        # fallback: unrolled select-accumulate (known-good, slower)
        row = lax.broadcasted_iota(jnp.int32, (tq, S), 0) + q_off
        col = lax.broadcasted_iota(jnp.int32, (tq, S), 1)
        didx_full = jnp.clip(col - row, -max_rel, max_rel) + max_rel
        attn2 = jnp.zeros((tq, S), f32)
        for t in range(T):
            attn2 = attn2 + jnp.where(didx_full == t, qs[:, t:t + 1], 0.0)

    logits = (attn1 + attn2) * inv_scale

    # ---- softmax (f32, EUP reciprocal) ---------------------------------------
    m = jnp.max(logits, axis=-1, keepdims=True)
    e = jnp.exp(logits - m)
    l = jnp.sum(e, axis=-1, keepdims=True)
    p = e * pl.reciprocal(l, approx=True)                               # (tq, S)

    # module semantics: attention probabilities are a returned output (bf16)
    attn_ref[...] = p.astype(attn_ref.dtype)

    # ---- values ---------------------------------------------------------------
    w1 = jnp.dot(p.astype(bf16), v, preferred_element_type=f32)         # (tq, Dh)

    if use_gather:
        # inverse skew: collect probabilities into the T relative buckets and
        # contract once against the (TP, Dh) rel-V table on the MXU.
        col_s = lax.broadcasted_iota(jnp.int32, (tq, S), 1)
        row_s = lax.broadcasted_iota(jnp.int32, (tq, S), 0) + q_off
        left = jnp.sum(jnp.where(col_s <= row_s - max_rel, p, 0.0),
                       axis=-1, keepdims=True)                          # bucket 0
        right = jnp.sum(jnp.where(col_s >= row_s + max_rel, p, 0.0),
                        axis=-1, keepdims=True)                         # bucket T-1

        inner = (lane_b >= 1) & (lane_b <= T - 2)
        b = jnp.zeros((tq, TP), f32)
        for cb in range(S // TP):
            tgt = row_b - max_rel + lane_b - cb * TP                    # local column
            valid = inner & (tgt >= 0) & (tgt < TP)
            g = jnp.take_along_axis(p[:, cb * TP:(cb + 1) * TP],
                                    jnp.clip(tgt, 0, TP - 1), axis=-1,
                                    mode="promise_in_bounds")
            b = b + jnp.where(valid, g, 0.0)
        b = jnp.where(lane_b == 0, left,
                      jnp.where(lane_b == T - 1, right, b))
        w2 = jnp.dot(b.astype(bf16), rv, preferred_element_type=f32)    # (tq, Dh)
    else:
        rv_f32 = rv.astype(f32)
        w2 = jnp.zeros((tq, Dh), f32)
        for t in range(T):
            colsum = jnp.sum(jnp.where(didx_full == t, p, 0.0),
                             axis=-1, keepdims=True)
            w2 = w2 + colsum * rv_f32[t:t + 1, :]

    ctx_ref[...] = (w1 + w2).astype(ctx_ref.dtype)


def attention_core(q, kT, v, rkT_pad, rv_pad, *, max_rel):
    """q, v: (B*H, S, Dh) bf16; kT: (B*H, Dh, S) bf16; padded rel tables bf16."""
    BH, S, Dh = q.shape
    TP = rv_pad.shape[0]
    T = 2 * max_rel + 1
    assert T <= TP, "relative table must fit in the 128 padded buckets"
    assert S % TP == 0, "sequence length must be a multiple of 128 (pad upstream)"

    tq = _pick_tile(S, 256, 8)
    inv_scale = 1.0 / math.sqrt(Dh)

    def build(use_gather):
        kernel = functools.partial(_attention_kernel, inv_scale=inv_scale,
                                   max_rel=max_rel, q_block=tq,
                                   use_gather=use_gather)
        return pl.pallas_call(
            kernel,
            grid=(BH, S // tq),
            out_shape=(
                jax.ShapeDtypeStruct((BH, S, S), jnp.bfloat16),
                jax.ShapeDtypeStruct((BH, S, Dh), jnp.bfloat16),
            ),
            in_specs=[
                pl.BlockSpec((None, tq, Dh), lambda bh, qi: (bh, qi, 0)),
                pl.BlockSpec((None, Dh, S), lambda bh, qi: (bh, 0, 0)),
                pl.BlockSpec((None, S, Dh), lambda bh, qi: (bh, 0, 0)),
                pl.BlockSpec((Dh, TP), lambda bh, qi: (0, 0)),
                pl.BlockSpec((TP, Dh), lambda bh, qi: (0, 0)),
            ],
            out_specs=(
                pl.BlockSpec((None, tq, S), lambda bh, qi: (bh, qi, 0)),
                pl.BlockSpec((None, tq, Dh), lambda bh, qi: (bh, qi, 0)),
            ),
            compiler_params=pltpu.CompilerParams(
                dimension_semantics=("parallel", "parallel"),
                vmem_limit_bytes=_vmem_limit_bytes(),
            ),
        )(q, kT, v, rkT_pad, rv_pad)

    try:
        return build(use_gather=True)
    except Exception:
        # TODO(synk): drop the fallback once lane dynamic-gather is guaranteed.
        return build(use_gather=False)


# ------------------------------ glue (plain JAX) -----------------------------


def relative_position_embeddings(table, length_q, length_k, max_rel):
    rq = jnp.arange(length_q)
    rk = jnp.arange(length_k)
    dist = rk[None, :] - rq[:, None]
    idx = jnp.clip(dist, -max_rel, max_rel) + max_rel
    return table[idx]  # (Lq, Lk, Dh)


def attention_forward(params, hidden_states, num_heads, max_rel=20):
    """Forward pass of Attention (self-attn, no mask, no KV cache, p_drop=0)."""
    B, S, E = hidden_states.shape
    H = num_heads
    Dh = E // H
    T = 2 * max_rel + 1
    TP = 128
    bf16 = jnp.bfloat16

    # fused QKV projection; activations & weights stored bf16 in HBM
    x2 = hidden_states.reshape(B * S, E).astype(bf16)
    w_qkv = jnp.concatenate(
        [params["w_qs"].T, params["w_ks"].T, params["w_vs"].T], axis=1
    ).astype(bf16)                                                       # (E, 3E)
    b_qkv = jnp.concatenate([params["b_qs"], params["b_ks"], params["b_vs"]])
    qkv = linear(x2, w_qkv, b_qkv, out_dtype=bf16)                       # (B*S, 3E)
    q, k, v = jnp.split(qkv, 3, axis=1)

    def to_heads(t):  # (B*S, E) -> (B*H, S, Dh)
        return t.reshape(B, S, H, Dh).transpose(0, 2, 1, 3).reshape(B * H, S, Dh)

    qh = to_heads(q)
    vh = to_heads(v)
    # K pre-transposed so the in-kernel content matmul RHS is (K, N)-oriented
    kTh = k.reshape(B, S, H, Dh).transpose(0, 2, 3, 1).reshape(B * H, Dh, S)

    # relative tables zero-padded to 128 lane-friendly buckets
    rkT_pad = jnp.zeros((Dh, TP), bf16).at[:, :T].set(
        params["rel_k_table"].T.astype(bf16))
    rv_pad = jnp.zeros((TP, Dh), bf16).at[:T, :].set(
        params["rel_v_table"].astype(bf16))

    attn_bf, ctx_bf = attention_core(qh, kTh, vh, rkT_pad, rv_pad, max_rel=max_rel)

    # kernel writes probs as bf16 (halves O(S^2) HBM writes); upcast outside for
    # module parity -- perf-critical callers can consume the bf16 array directly.
    attn = attn_bf.astype(jnp.float32).reshape(B, H, S, S)
    xctx = ctx_bf.reshape(B, H, S, Dh).transpose(0, 2, 1, 3).reshape(B * S, E)
    out = linear(xctx, params["fc_w"].T.astype(bf16), params["fc_b"],
                 out_dtype=jnp.float32).reshape(B, S, E)
    # is_decoder=False -> past_key_value stays None
    return out, attn, None


# ----------------------------- pure-JAX reference ----------------------------


def reference_forward(params, hidden_states, num_heads, max_rel=20):
    B, S, E = hidden_states.shape
    H = num_heads
    Dh = E // H

    def lin(x, w, b):
        return x @ w.T + b

    q = lin(hidden_states, params["w_qs"], params["b_qs"]).reshape(B, S, H, Dh)
    k = lin(hidden_states, params["w_ks"], params["b_ks"]).reshape(B, S, H, Dh)
    v = lin(hidden_states, params["w_vs"], params["b_vs"]).reshape(B, S, H, Dh)

    r_q1 = q.transpose(0, 2, 1, 3)
    r_k1 = k.transpose(0, 2, 3, 1)
    attn1 = r_q1 @ r_k1

    r_q2 = q.transpose(1, 0, 2, 3).reshape(S, B * H, Dh)
    r_k2 = relative_position_embeddings(params["rel_k_table"], S, S, max_rel)
    attn2 = r_q2 @ r_k2.transpose(0, 2, 1)
    attn2 = attn2.reshape(S, B, H, S).transpose(1, 2, 0, 3)

    attn = (attn1 + attn2) / math.sqrt(Dh)
    attn = jax.nn.softmax(attn, axis=-1)

    r_v1 = v.transpose(0, 2, 1, 3)
    w1 = attn @ r_v1
    r_v2 = relative_position_embeddings(params["rel_v_table"], S, S, max_rel)
    w2 = attn.transpose(2, 0, 1, 3).reshape(S, B * H, S) @ r_v2
    w2 = w2.transpose(1, 0, 2).reshape(B, H, S, Dh)

    x = (w1 + w2).transpose(0, 2, 1, 3).reshape(B, S, E)
    x = lin(x, params["fc_w"], params["fc_b"])
    return x, attn


# ----------------------------------- main ------------------------------------


def init_params(key, embed_dim, num_heads, max_rel=20):
    head_dim = embed_dim // num_heads
    keys = jax.random.split(key, 10)

    def xavier(k, shape):
        fan_in, fan_out = shape[-1], shape[0]
        bound = math.sqrt(6.0 / (fan_in + fan_out))
        return jax.random.uniform(k, shape, jnp.float32, -bound, bound)

    return {
        "w_qs": xavier(keys[0], (embed_dim, embed_dim)),
        "b_qs": jax.random.normal(keys[1], (embed_dim,), jnp.float32) * 0.02,
        "w_ks": xavier(keys[2], (embed_dim, embed_dim)),
        "b_ks": jax.random.normal(keys[3], (embed_dim,), jnp.float32) * 0.02,
        "w_vs": xavier(keys[4], (embed_dim, embed_dim)),
        "b_vs": jax.random.normal(keys[5], (embed_dim,), jnp.float32) * 0.02,
        "fc_w": xavier(keys[6], (embed_dim, embed_dim)),
        "fc_b": jax.random.normal(keys[7], (embed_dim,), jnp.float32) * 0.02,
        "rel_k_table": xavier(keys[8], (2 * max_rel + 1, head_dim)),
        "rel_v_table": xavier(keys[9], (2 * max_rel + 1, head_dim)),
    }


if __name__ == "__main__":
    # S is a multiple of 128 so blocks are lane-dense (Dh = 16, T = 41 buckets).
    B, S, E, H = 2, 128, 64, 4
    key = jax.random.PRNGKey(0)
    k_param, k_x = jax.random.split(key)

    params = init_params(k_param, E, H)
    hidden_states = jax.random.normal(k_x, (B, S, E), jnp.float32)

    out, attn, past_kv = attention_forward(params, hidden_states, H)
    out = jax.block_until_ready(out)
    attn = jax.block_until_ready(attn)

    ref_out, ref_attn = reference_forward(params, hidden_states, H)
    assert past_kv is None
    # bf16 MXU operands + bf16 prob output + approx reciprocal (f32 softmax/acc)
    assert jnp.allclose(attn, ref_attn, rtol=5e-2, atol=5e-2), "attn mismatch"
    assert jnp.allclose(out, ref_out, rtol=5e-2, atol=5e-2), "output mismatch"

    print("KERNEL_OK")
</pallas_src>

<mosaic_0001>
module attributes {stable_mosaic.version = 11 : i64} {
  func.func @_matmul_bias_kernel(%arg0: i32, %arg1: i32, %arg2: i32, %arg3: memref<256x64xbf16, #tpu.memory_space<vmem>>, %arg4: memref<64x192xbf16, #tpu.memory_space<vmem>>, %arg5: memref<1x192xf32, #tpu.memory_space<vmem>>, %arg6: memref<256x192xbf16, #tpu.memory_space<vmem>>, %arg7: memref<256x192xf32, #tpu.memory_space<vmem>>) attributes {dimension_semantics = [#tpu.dimension_semantics<parallel>, #tpu.dimension_semantics<parallel>, #tpu.dimension_semantics<arbitrary>], iteration_bounds = array<i64: 1, 1, 1>, scalar_prefetch = 0 : i64, scratch_operands = 1 : i64, tpu.core_type = #tpu.core_type<tc>, window_params = [{transform_indices = @transform_0, window_bounds = array<i64: 256, 64>}, {transform_indices = @transform_1, window_bounds = array<i64: 64, 192>}, {transform_indices = @transform_2, window_bounds = array<i64: 1, 192>}, {transform_indices = @transform_3, window_bounds = array<i64: 256, 192>}]} {
    %c0_i32 = arith.constant 0 : i32
    %0 = arith.cmpi eq, %arg2, %c0_i32 : i32
    %1 = arith.extui %0 : i1 to i32
    %c0_i32_0 = arith.constant 0 : i32
    %2 = arith.cmpi ne, %1, %c0_i32_0 : i32
    scf.if %2 {
      %cst_10 = arith.constant 0.000000e+00 : f32
      %12 = vector.broadcast %cst_10 : f32 to vector<256x192xf32>
      %c0_11 = arith.constant 0 : index
      %c0_12 = arith.constant 0 : index
      %13 = vector.load %arg7[%c0_11, %c0_12] : memref<256x192xf32, #tpu.memory_space<vmem>>, vector<256x192xf32>
      tpu.vector_store %arg7[%c0_11, %c0_12], %12 {strides = array<i32>} : memref<256x192xf32, #tpu.memory_space<vmem>>, vector<256x192xf32>,
    } else {
    }
    %c0 = arith.constant 0 : index
    %c0_1 = arith.constant 0 : index
    %3 = vector.load %arg7[%c0, %c0_1] : memref<256x192xf32, #tpu.memory_space<vmem>>, vector<256x192xf32>
    %c0_2 = arith.constant 0 : index
    %c0_3 = arith.constant 0 : index
    %4 = vector.load %arg3[%c0_2, %c0_3] : memref<256x64xbf16, #tpu.memory_space<vmem>>, vector<256x64xbf16>
    %c0_4 = arith.constant 0 : index
    %c0_5 = arith.constant 0 : index
    %5 = vector.load %arg4[%c0_4, %c0_5] : memref<64x192xbf16, #tpu.memory_space<vmem>>, vector<64x192xbf16>
    %cst = arith.constant dense<0.000000e+00> : vector<256x192xf32>
    %6 = tpu.matmul %4, %5, %cst {dimension_numbers = #tpu.dot_dimension_numbers<[1], [0], [0], [1], [0, 0, 1, 1], [], []>} : vector<256x64xbf16>, vector<64x192xbf16>, vector<256x192xf32> -> vector<256x192xf32>
    %7 = arith.addf %3, %6 : vector<256x192xf32>
    %c0_6 = arith.constant 0 : index
    %c0_7 = arith.constant 0 : index
    %8 = vector.load %arg7[%c0_6, %c0_7] : memref<256x192xf32, #tpu.memory_space<vmem>>, vector<256x192xf32>
    tpu.vector_store %arg7[%c0_6, %c0_7], %7 {strides = array<i32>} : memref<256x192xf32, #tpu.memory_space<vmem>>, vector<256x192xf32>,
    %c0_i32_8 = arith.constant 0 : i32
    %9 = arith.cmpi eq, %arg2, %c0_i32_8 : i32
    %10 = arith.extui %9 : i1 to i32
    %c0_i32_9 = arith.constant 0 : i32
    %11 = arith.cmpi ne, %10, %c0_i32_9 : i32
    scf.if %11 {
      %c0_10 = arith.constant 0 : index
      %c0_11 = arith.constant 0 : index
      %12 = vector.load %arg7[%c0_10, %c0_11] : memref<256x192xf32, #tpu.memory_space<vmem>>, vector<256x192xf32>
      %c0_12 = arith.constant 0 : index
      %c0_13 = arith.constant 0 : index
      %13 = vector.load %arg5[%c0_12, %c0_13] : memref<1x192xf32, #tpu.memory_space<vmem>>, vector<1x192xf32>
      %14 = vector.broadcast %13 : vector<1x192xf32> to vector<256x192xf32>
      %15 = arith.addf %12, %14 : vector<256x192xf32>
      %16 = arith.truncf %15 : vector<256x192xf32> to vector<256x192xbf16>
      %c0_14 = arith.constant 0 : index
      %c0_15 = arith.constant 0 : index
      %17 = vector.load %arg6[%c0_14, %c0_15] : memref<256x192xbf16, #tpu.memory_space<vmem>>, vector<256x192xbf16>
      tpu.vector_store %arg6[%c0_14, %c0_15], %16 {strides = array<i32>} : memref<256x192xbf16, #tpu.memory_space<vmem>>, vector<256x192xbf16>,
    } else {
    }
    return
  }
  func.func @transform_0(%arg0: i32, %arg1: i32, %arg2: i32) -> (i32, i32) {
    %c0_i32 = arith.constant 0 : i32
    return %arg0, %arg2 : i32, i32
  }
  func.func @transform_1(%arg0: i32, %arg1: i32, %arg2: i32) -> (i32, i32) {
    %c0_i32 = arith.constant 0 : i32
    return %arg2, %arg1 : i32, i32
  }
  func.func @transform_2(%arg0: i32, %arg1: i32, %arg2: i32) -> (i32, i32) {
    %c0_i32 = arith.constant 0 : i32
    %c0_i32_0 = arith.constant 0 : i32
    return %c0_i32, %arg1 : i32, i32
  }
  func.func @transform_3(%arg0: i32, %arg1: i32, %arg2: i32) -> (i32, i32) {
    %c0_i32 = arith.constant 0 : i32
    return %arg0, %arg1 : i32, i32
  }
}

</mosaic_0001>

<bundles_post_ra>
// kernel: tpu_custom_call.1
= control target key start
LH: loop header
LB: loop body
LE: loop exit
PB: predicated region body
PF: predicated region fallthrough
CT: control target
= control target key end

     0   :  { %vm20_vm0 = vcmask 523264   ;;  %v1194_v1 = vmov 0   ;;  %v1195_v2 = vmov 0.0   ;;  %v747_v26 = vlaneseq  ;;  %s1621_s1 = inlined_call_operand.vmem [shape: bf16[64,192], index: 1, kind: input, shape index: {}]   ;;  %s1622_s0 = inlined_call_operand.vmem [shape: bf16[256,64], index: 0, kind: input, shape index: {}]   ;;  %s1623_s2 = inlined_call_operand.vmem [shape: f32[1,192], index: 2, kind: input, shape index: {}]   ;;  %s1624_s3 = inlined_call_operand.vmem [shape: bf16[256,192], index: 3, kind: output, shape index: {}]  }
   0x1   :  { %v1166_v0 = vld [vmem:[%s1621_s1 + $0x4] ss:$8 sps:$4 sm:$0xff]   ;;  %389 = vmatprep.mubr.bf16.mxu0 %v1194_v1  ;;  %469 = vmatprep.mubr.bf16.mxu1 %v1194_v1  ;;  %21 = vst.msk [vmem:[#allocation2 + $0x8] sm:$0xff] %vm20_vm0, %v1195_v2  ;;  %23 = vst.msk [vmem:[#allocation2 + $0x18] sm:$0xff] %vm20_vm0, %v1195_v2  ;;  %v1168_v3 = vld [vmem:[%s1621_s1] ss:$8 sps:$4 sm:$0xff]  }
   0x2   :  { %25 = vst.msk [vmem:[#allocation2 + $0x28] sm:$0xff] %vm20_vm0, %v1195_v2  ;;  %27 = vst.msk [vmem:[#allocation2 + $0x38] sm:$0xff] %vm20_vm0, %v1195_v2  ;;  %357 = vmatprep.subr.bf16.mxu0 %v1166_v0  ;;  %1156 = vmatprep.subr.bf16.mxu1 %v1166_v0  ;;  %v1169_v4 = vld [vmem:[%s1621_s1 + $0x14] ss:$8 sps:$4 sm:$0xff]   ;;  %v1171_v5 = vld [vmem:[%s1621_s1 + $0x10] ss:$8 sps:$4 sm:$0xff]  }
   0x3   :  { %29 = vst.msk [vmem:[#allocation2 + $0x48] sm:$0xff] %vm20_vm0, %v1195_v2  ;;  %31 = vst.msk [vmem:[#allocation2 + $0x58] sm:$0xff] %vm20_vm0, %v1195_v2  ;;  %358 = vmatpush1.bf16.msra.mxu0 %v1168_v3  ;;  %1160 = vmatpush1.bf16.msra.mxu1 %v1168_v3  ;;  %v1172_v6 = vld [vmem:[%s1621_s1 + $0x24] ss:$8 sps:$4 sm:$0xff]   ;;  %v1174_v7 = vld [vmem:[%s1621_s1 + $0x20] ss:$8 sps:$4 sm:$0xff]  }
   0x4   :  { %33 = vst.msk [vmem:[#allocation2 + $0x68] sm:$0xff] %vm20_vm0, %v1195_v2  ;;  %35 = vst.msk [vmem:[#allocation2 + $0x78] sm:$0xff] %vm20_vm0, %v1195_v2  ;;  %359 = vmatprep.subr.bf16.mxu0 %v1169_v4  ;;  %1157 = vmatprep.subr.bf16.mxu1 %v1169_v4  ;;  %v1175_v8 = vld [vmem:[%s1621_s1 + $0x34] ss:$8 sps:$4 sm:$0xff]   ;;  %v1177_v9 = vld [vmem:[%s1621_s1 + $0x30] ss:$8 sps:$4 sm:$0xff]  }
   0x5   :  { %37 = vst.msk [vmem:[#allocation2 + $0x88] sm:$0xff] %vm20_vm0, %v1195_v2  ;;  %39 = vst.msk [vmem:[#allocation2 + $0x98] sm:$0xff] %vm20_vm0, %v1195_v2  ;;  %v1178_v10 = vld [vmem:[%s1622_s0] sm:$0xff]   ;;  %v1180_v12 = vld [vmem:[%s1622_s0 + $0x8] sm:$0xff]   ;;  %v748_v27 = vshrl.u32 %v747_v26, 7  ;;  %vm1013_vm1 = vcmask 1043456  }
   0x6   :  { %41 = vst.msk [vmem:[#allocation2 + $0xa8] sm:$0xff] %vm20_vm0, %v1195_v2  ;;  %43 = vst.msk [vmem:[#allocation2 + $0xb8] sm:$0xff] %vm20_vm0, %v1195_v2  ;;  %v1179_v11 = vld [vmem:[%s1622_s0 + $0x40] sm:$0xff]   ;;  %v1181_v13 = vld [vmem:[%s1622_s0 + $0x48] sm:$0xff]   ;;  %vm1014_vm2 = vcmask 523268  }
   0x7   :  { %45 = vst.msk [vmem:[#allocation2 + $0xc8] sm:$0xff] %vm20_vm0, %v1195_v2  ;;  %47 = vst.msk [vmem:[#allocation2 + $0xd8] sm:$0xff] %vm20_vm0, %v1195_v2  ;;  %360 = vmatpush1.bf16.msra.mxu0 %v1171_v5  ;;  %1161 = vmatpush1.bf16.msra.mxu1 %v1171_v5  ;;  %v1182_v14 = vld [vmem:[%s1622_s0 + $0x10] sm:$0xff]   ;;  %v1184_v16 = vld [vmem:[%s1622_s0 + $0x18] sm:$0xff]   ;;  %v749_v40 = vsub.s32 0, %v748_v27  ;;  %v753_v44 = vsub.s32 1, %v748_v27 }
   0x8   :  { %49 = vst.msk [vmem:[#allocation2 + $0xe8] sm:$0xff] %vm20_vm0, %v1195_v2  ;;  %51 = vst.msk [vmem:[#allocation2 + $0xf8] sm:$0xff] %vm20_vm0, %v1195_v2  ;;  %361 = vmatprep.subr.bf16.mxu0 %v1172_v6  ;;  %1158 = vmatprep.subr.bf16.mxu1 %v1172_v6  ;;  %v1183_v15 = vld [vmem:[%s1622_s0 + $0x50] sm:$0xff]   ;;  %v1185_v17 = vld [vmem:[%s1622_s0 + $0x58] sm:$0xff]  }
   0x9   :  { %53 = vst.msk [vmem:[#allocation2 + $0x108] sm:$0xff] %vm20_vm0, %v1195_v2  ;;  %55 = vst.msk [vmem:[#allocation2 + $0x118] sm:$0xff] %vm20_vm0, %v1195_v2  ;;  %v1186_v18 = vld [vmem:[%s1622_s0 + $0x20] sm:$0xff]   ;;  %v1188_v20 = vld [vmem:[%s1622_s0 + $0x28] sm:$0xff]  }
   0xa   :  { %57 = vst.msk [vmem:[#allocation2 + $0x128] sm:$0xff] %vm20_vm0, %v1195_v2  ;;  %59 = vst.msk [vmem:[#allocation2 + $0x138] sm:$0xff] %vm20_vm0, %v1195_v2  ;;  %v1187_v19 = vld [vmem:[%s1622_s0 + $0x60] sm:$0xff]   ;;  %v1189_v21 = vld [vmem:[%s1622_s0 + $0x68] sm:$0xff]  }
   0xb   :  { %61 = vst.msk [vmem:[#allocation2 + $0x148] sm:$0xff] %vm20_vm0, %v1195_v2  ;;  %63 = vst.msk [vmem:[#allocation2 + $0x158] sm:$0xff] %vm20_vm0, %v1195_v2  ;;  %362 = vmatpush1.bf16.msra.mxu0 %v1174_v7  ;;  %1162 = vmatpush1.bf16.msra.mxu1 %v1174_v7  ;;  %v1190_v22 = vld [vmem:[%s1622_s0 + $0x30] sm:$0xff]   ;;  %v1192_v24 = vld [vmem:[%s1622_s0 + $0x38] sm:$0xff]  }
   0xc   :  { %65 = vst.msk [vmem:[#allocation2 + $0x168] sm:$0xff] %vm20_vm0, %v1195_v2  ;;  %67 = vst.msk [vmem:[#allocation2 + $0x178] sm:$0xff] %vm20_vm0, %v1195_v2  ;;  %363 = vmatprep.subr.bf16.mxu0 %v1175_v8  ;;  %1159 = vmatprep.subr.bf16.mxu1 %v1175_v8  ;;  %v1191_v23 = vld [vmem:[%s1622_s0 + $0x70] sm:$0xff]   ;;  %v1193_v25 = vld [vmem:[%s1622_s0 + $0x78] sm:$0xff]  }
   0xd   :  { %69 = vst.msk [vmem:[#allocation2 + $0x188] sm:$0xff] %vm20_vm0, %v1195_v2  ;;  %71 = vst.msk [vmem:[#allocation2 + $0x198] sm:$0xff] %vm20_vm0, %v1195_v2  ;;  %v85_v28 = vld [vmem:[#allocation2 + $0x8] sm:$0xff]  ;;  %v87_v34 = vld [vmem:[#allocation2 + $0x18] sm:$0xff] }
   0xe   :  { %73 = vst.msk [vmem:[#allocation2 + $0x1a8] sm:$0xff] %vm20_vm0, %v1195_v2  ;;  %75 = vst.msk [vmem:[#allocation2 + $0x1b8] sm:$0xff] %vm20_vm0, %v1195_v2  ;;  %v745_v43 = vld [vmem:[%s1623_s2] sm:$0x3]  ;;  %v89_v48 = vld [vmem:[#allocation2 + $0x28] sm:$0xff] }
   0xf   :  { %77 = vst.msk [vmem:[#allocation2 + $0x1c8] sm:$0xff] %vm20_vm0, %v1195_v2  ;;  %79 = vst.msk [vmem:[#allocation2 + $0x1d8] sm:$0xff] %vm20_vm0, %v1195_v2  ;;  %364 = vmatpush1.bf16.msra.mxu0 %v1177_v9  ;;  %1163 = vmatpush1.bf16.msra.mxu1 %v1177_v9  ;;  %v1359_v47 = vrot.slane %v745_v43, %v749_v40  ;;  %v1361_v50 = vrot.slane %v745_v43, %v753_v44  ;;  %v91_v55 = vld [vmem:[#allocation2 + $0x38] sm:$0xff] }
  0x10   :  { %81 = vst.msk [vmem:[#allocation2 + $0x1e8] sm:$0xff] %vm20_vm0, %v1195_v2  ;;  %83 = vst.msk [vmem:[#allocation2 + $0x1f8] sm:$0xff] %vm20_vm0, %v1195_v2  ;;  %v117_v29 = vld [vmem:[#allocation2 + $0x108] sm:$0xff]  ;;  %v119_v35 = vld [vmem:[#allocation2 + $0x118] sm:$0xff] }
  0x11   :  { %v121_v49 = vld [vmem:[#allocation2 + $0x128] sm:$0xff]  ;;  %v123_v56 = vld [vmem:[#allocation2 + $0x138] sm:$0xff]  ;;  %vm1371_vm3 = vmor %vm1014_vm2, %vm1013_vm1 }
  0x12   :  { %1076 = vmatmul.mubr.msk.bf16.vlgmr.msra.gmra.mrb[0].mxu0 %vm20_vm0, %v1178_v10  ;;  %1084 = vmatmul.mubr.msk.bf16.vlgmr.msra.gmra.mrb[0].mxu1 %vm20_vm0, %v1179_v11 }
  0x13   :  { %399 = vmatprep.mubr.bf16.mxu0 %v1194_v1  ;;  %479 = vmatprep.mubr.bf16.mxu1 %v1194_v1 }
  0x1a   :  { %1077 = vmatmul.mubr.msk.bf16.gmra.mrb[4].mxu0 %vm20_vm0, %v1180_v12  ;;  %1085 = vmatmul.mubr.msk.bf16.gmra.mrb[4].mxu1 %vm20_vm0, %v1181_v13 }
  0x1b   :  { %409 = vmatprep.mubr.bf16.mxu0 %v1194_v1  ;;  %489 = vmatprep.mubr.bf16.mxu1 %v1194_v1 }
  0x22   :  { %1078 = vmatmul.mubr.msk.bf16.gmra.mrb[8].mxu0 %vm20_vm0, %v1182_v14  ;;  %1086 = vmatmul.mubr.msk.bf16.gmra.mrb[8].mxu1 %vm20_vm0, %v1183_v15 }
  0x23   :  { %419 = vmatprep.mubr.bf16.mxu0 %v1194_v1  ;;  %499 = vmatprep.mubr.bf16.mxu1 %v1194_v1 }
  0x2a   :  { %1079 = vmatmul.mubr.msk.bf16.gmra.mrb[12].mxu0 %vm20_vm0, %v1184_v16  ;;  %1087 = vmatmul.mubr.msk.bf16.gmra.mrb[12].mxu1 %vm20_vm0, %v1185_v17  ;;  %v93_v16 = vld [vmem:[#allocation2 + $0x48] sm:$0xff] }
  0x2b   :  { %429 = vmatprep.mubr.bf16.mxu0 %v1194_v1  ;;  %509 = vmatprep.mubr.bf16.mxu1 %v1194_v1  ;;  %v125_v17 = vld [vmem:[#allocation2 + $0x148] sm:$0xff] }
  0x32   :  { %1080 = vmatmul.mubr.msk.bf16.gmra.mrb[16].mxu0 %vm20_vm0, %v1186_v18  ;;  %1088 = vmatmul.mubr.msk.bf16.gmra.mrb[16].mxu1 %vm20_vm0, %v1187_v19 }
  0x33   :  { %439 = vmatprep.mubr.bf16.mxu0 %v1194_v1  ;;  %519 = vmatprep.mubr.bf16.mxu1 %v1194_v1 }
  0x3a   :  { %1081 = vmatmul.mubr.msk.bf16.gmra.mrb[20].mxu0 %vm20_vm0, %v1188_v20  ;;  %1089 = vmatmul.mubr.msk.bf16.gmra.mrb[20].mxu1 %vm20_vm0, %v1189_v21 }
  0x3b   :  { %449 = vmatprep.mubr.bf16.mxu0 %v1194_v1  ;;  %529 = vmatprep.mubr.bf16.mxu1 %v1194_v1 }
  0x42   :  { %1082 = vmatmul.mubr.msk.bf16.gmra.mrb[24].mxu0 %vm20_vm0, %v1190_v22  ;;  %1090 = vmatmul.mubr.msk.bf16.gmra.mrb[24].mxu1 %vm20_vm0, %v1191_v23 }
  0x43   :  { %459 = vmatprep.mubr.bf16.mxu0 %v1194_v1  ;;  %539 = vmatprep.mubr.bf16.mxu1 %v1194_v1 }
  0x4a   :  { %1083 = vmatmul.mubr.msk.bf16.gmra.mrb[28].mxu0 %vm20_vm0, %v1192_v24  ;;  %1091 = vmatmul.mubr.msk.bf16.gmra.mrb[28].mxu1 %vm20_vm0, %v1193_v25  ;;  %v95_v24 = vld [vmem:[#allocation2 + $0x58] sm:$0xff] }
  0x4b   :  { %v127_v25 = vld [vmem:[#allocation2 + $0x158] sm:$0xff] }
  0xe5   :  { %v391_v30 = vpop.f32.mrb[0].mxu0  ;;  %v471_v31 = vpop.f32.mrb[0].mxu1 }
  0xe6   :  { %v393_v32 = vpop.f32.mrb[1].mxu0  ;;  %v473_v33 = vpop.f32.mrb[1].mxu1  ;;  %v757_v61 = vadd.f32 %v1359_v47, %v391_v30  ;;  %v789_v62 = vadd.f32 %v1359_v47, %v471_v31 }
  0xe7   :  { %v551_v36 = vadd.f32 %v393_v32, %v85_v28  ;;  %v583_v37 = vadd.f32 %v473_v33, %v117_v29  ;;  %v395_v38 = vpop.f32.mrb[2].mxu0  ;;  %v475_v39 = vpop.f32.mrb[2].mxu1 }
  0xe8   :  { %v397_v41 = vpop.f32.mrb[3].mxu0  ;;  %v477_v42 = vpop.f32.mrb[3].mxu1  ;;  %v759_v8 = vadd.f32 %v1359_v47, %v395_v38  ;;  %v791_v9 = vadd.f32 %v1359_v47, %v475_v39 }
  0xe9   :  { %615 = vst.msk [vmem:[#allocation2 + $0x8] sm:$0xff] %vm20_vm0, %v551_v36  ;;  %647 = vst.msk [vmem:[#allocation2 + $0x108] sm:$0xff] %vm20_vm0, %v583_v37  ;;  %v553_v45 = vadd.f32 %v397_v41, %v87_v34  ;;  %v585_v46 = vadd.f32 %v477_v42, %v119_v35 }
  0xeb   :  { %617 = vst.msk [vmem:[#allocation2 + $0x18] sm:$0xff] %vm20_vm0, %v553_v45  ;;  %649 = vst.msk [vmem:[#allocation2 + $0x118] sm:$0xff] %vm20_vm0, %v585_v46 }
  0xed   :  { %v401_v51 = vpop.f32.mrb[4].mxu0  ;;  %v481_v52 = vpop.f32.mrb[4].mxu1 }
  0xee   :  { %v403_v53 = vpop.f32.mrb[5].mxu0  ;;  %v483_v54 = vpop.f32.mrb[5].mxu1  ;;  %v761_v30 = vadd.f32 %v1359_v47, %v401_v51  ;;  %v793_v31 = vadd.f32 %v1359_v47, %v481_v52  ;;  %v129_v51 = vld [vmem:[#allocation2 + $0x168] sm:$0xff] }
  0xef   :  { %v555_v57 = vadd.f32 %v403_v53, %v89_v48  ;;  %v587_v58 = vadd.f32 %v483_v54, %v121_v49  ;;  %v405_v59 = vpop.f32.mrb[6].mxu0  ;;  %v485_v60 = vpop.f32.mrb[6].mxu1  ;;  %v97_v49 = vld [vmem:[#allocation2 + $0x68] sm:$0xff] }
  0xf0   :  { %v682_v63 = vld [vmem:[#allocation2 + $0x8] sm:$0xff]  ;;  %v407_v1 = vpop.f32.mrb[7].mxu0  ;;  %v487_v2 = vpop.f32.mrb[7].mxu1  ;;  %v763_v40 = vadd.f32 %v1359_v47, %v405_v59  ;;  %v795_v41 = vadd.f32 %v1359_v47, %v485_v60  ;;  %v131_v59 = vld [vmem:[#allocation2 + $0x178] sm:$0xff] }
  0xf1   :  { %v714_v0 = vld [vmem:[#allocation2 + $0x108] sm:$0xff]  ;;  %v758_v3 = vadd.f32 %v1361_v50, %v682_v63  ;;  %619 = vst.msk [vmem:[#allocation2 + $0x28] sm:$0xff] %vm20_vm0, %v555_v57  ;;  %651 = vst.msk [vmem:[#allocation2 + $0x128] sm:$0xff] %vm20_vm0, %v587_v58  ;;  %v557_v5 = vadd.f32 %v407_v1, %v91_v55  ;;  %v589_v6 = vadd.f32 %v487_v2, %v123_v56  ;;  %v99_v58 = vld [vmem:[#allocation2 + $0x78] sm:$0xff] }
  0xf2   :  { %v790_v4 = vadd.f32 %v1361_v50, %v714_v0  ;;  %v684_v10 = vld [vmem:[#allocation2 + $0x18] sm:$0xff] }
  0xf3   :  { %v716_v11 = vld [vmem:[#allocation2 + $0x118] sm:$0xff]  ;;  %v1124_v12 = vpack.c.bf16 %v758_v3, %v757_v61  ;;  %v760_v14 = vadd.f32 %v1361_v50, %v684_v10  ;;  %621 = vst.msk [vmem:[#allocation2 + $0x38] sm:$0xff] %vm20_vm0, %v557_v5  ;;  %653 = vst.msk [vmem:[#allocation2 + $0x138] sm:$0xff] %vm20_vm0, %v589_v6 }
  0xf4   :  { %v1140_v13 = vpack.c.bf16 %v790_v4, %v789_v62  ;;  %v792_v15 = vadd.f32 %v1361_v50, %v716_v11 }
  0xf5   :  { %1016 = vst.msk [vmem:[%s1624_s3] sm:$0xff] %vm1371_vm3, %v1124_v12  ;;  %v1125_v18 = vpack.c.bf16 %v760_v14, %v759_v8  ;;  %v411_v20 = vpop.f32.mrb[8].mxu0  ;;  %v491_v21 = vpop.f32.mrb[8].mxu1 }
  0xf6   :  { %1032 = vst.msk [vmem:[%s1624_s3 + $0x80] sm:$0xff] %vm1371_vm3, %v1140_v13  ;;  %v1141_v19 = vpack.c.bf16 %v792_v15, %v791_v9  ;;  %v413_v22 = vpop.f32.mrb[9].mxu0  ;;  %v493_v23 = vpop.f32.mrb[9].mxu1  ;;  %v765_v0 = vadd.f32 %v1359_v47, %v411_v20  ;;  %v797_v1 = vadd.f32 %v1359_v47, %v491_v21  ;;  %v133_v20 = vld [vmem:[#allocation2 + $0x188] sm:$0xff] }
  0xf7   :  { %1017 = vst.msk [vmem:[%s1624_s3 + $0x8] sm:$0xff] %vm1371_vm3, %v1125_v18  ;;  %v559_v26 = vadd.f32 %v413_v22, %v93_v16  ;;  %v591_v27 = vadd.f32 %v493_v23, %v125_v17  ;;  %v415_v28 = vpop.f32.mrb[10].mxu0  ;;  %v495_v29 = vpop.f32.mrb[10].mxu1 }
  0xf8   :  { %1033 = vst.msk [vmem:[%s1624_s3 + $0x88] sm:$0xff] %vm1371_vm3, %v1141_v19  ;;  %v686_v32 = vld [vmem:[#allocation2 + $0x28] sm:$0xff]  ;;  %v417_v34 = vpop.f32.mrb[11].mxu0  ;;  %v497_v35 = vpop.f32.mrb[11].mxu1  ;;  %v767_v11 = vadd.f32 %v1359_v47, %v415_v28  ;;  %v799_v12 = vadd.f32 %v1359_v47, %v495_v29  ;;  %v135_v28 = vld [vmem:[#allocation2 + $0x198] sm:$0xff] }
  0xf9   :  { %v718_v33 = vld [vmem:[#allocation2 + $0x128] sm:$0xff]  ;;  %v762_v36 = vadd.f32 %v1361_v50, %v686_v32  ;;  %623 = vst.msk [vmem:[#allocation2 + $0x48] sm:$0xff] %vm20_vm0, %v559_v26  ;;  %655 = vst.msk [vmem:[#allocation2 + $0x148] sm:$0xff] %vm20_vm0, %v591_v27  ;;  %v561_v38 = vadd.f32 %v417_v34, %v95_v24  ;;  %v593_v39 = vadd.f32 %v497_v35, %v127_v25  ;;  %v103_v27 = vld [vmem:[#allocation2 + $0x98] sm:$0xff] }
  0xfa   :  { %v794_v37 = vadd.f32 %v1361_v50, %v718_v33  ;;  %v688_v42 = vld [vmem:[#allocation2 + $0x38] sm:$0xff]  ;;  %v101_v19 = vld [vmem:[#allocation2 + $0x88] sm:$0xff] }
  0xfb   :  { %v720_v43 = vld [vmem:[#allocation2 + $0x138] sm:$0xff]  ;;  %v1126_v44 = vpack.c.bf16 %v762_v36, %v761_v30  ;;  %v764_v46 = vadd.f32 %v1361_v50, %v688_v42  ;;  %625 = vst.msk [vmem:[#allocation2 + $0x58] sm:$0xff] %vm20_vm0, %v561_v38  ;;  %657 = vst.msk [vmem:[#allocation2 + $0x158] sm:$0xff] %vm20_vm0, %v593_v39 }
  0xfc   :  { %v1142_v45 = vpack.c.bf16 %v794_v37, %v793_v31  ;;  %v796_v48 = vadd.f32 %v1361_v50, %v720_v43 }
  0xfd   :  { %1018 = vst.msk [vmem:[%s1624_s3 + $0x10] sm:$0xff] %vm1371_vm3, %v1126_v44  ;;  %v1127_v52 = vpack.c.bf16 %v764_v46, %v763_v40  ;;  %v421_v54 = vpop.f32.mrb[12].mxu0  ;;  %v501_v55 = vpop.f32.mrb[12].mxu1 }
  0xfe   :  { %1034 = vst.msk [vmem:[%s1624_s3 + $0x90] sm:$0xff] %vm1371_vm3, %v1142_v45  ;;  %v1143_v53 = vpack.c.bf16 %v796_v48, %v795_v41  ;;  %v423_v56 = vpop.f32.mrb[13].mxu0  ;;  %v503_v57 = vpop.f32.mrb[13].mxu1  ;;  %v769_v33 = vadd.f32 %v1359_v47, %v421_v54  ;;  %v801_v34 = vadd.f32 %v1359_v47, %v501_v55  ;;  %v137_v54 = vld [vmem:[#allocation2 + $0x1a8] sm:$0xff] }
  0xff   :  { %1019 = vst.msk [vmem:[%s1624_s3 + $0x18] sm:$0xff] %vm1371_vm3, %v1127_v52  ;;  %v563_v60 = vadd.f32 %v423_v56, %v97_v49  ;;  %v595_v61 = vadd.f32 %v503_v57, %v129_v51  ;;  %v425_v62 = vpop.f32.mrb[14].mxu0  ;;  %v505_v63 = vpop.f32.mrb[14].mxu1 }
 0x100   :  { %1035 = vst.msk [vmem:[%s1624_s3 + $0x98] sm:$0xff] %vm1371_vm3, %v1143_v53  ;;  %v690_v2 = vld [vmem:[#allocation2 + $0x48] sm:$0xff]  ;;  %v427_v4 = vpop.f32.mrb[15].mxu0  ;;  %v507_v5 = vpop.f32.mrb[15].mxu1  ;;  %v771_v43 = vadd.f32 %v1359_v47, %v425_v62  ;;  %v803_v44 = vadd.f32 %v1359_v47, %v505_v63  ;;  %v139_v62 = vld [vmem:[#allocation2 + $0x1b8] sm:$0xff] }
 0x101   :  { %v722_v3 = vld [vmem:[#allocation2 + $0x148] sm:$0xff]  ;;  %v766_v6 = vadd.f32 %v1361_v50, %v690_v2  ;;  %627 = vst.msk [vmem:[#allocation2 + $0x68] sm:$0xff] %vm20_vm0, %v563_v60  ;;  %659 = vst.msk [vmem:[#allocation2 + $0x168] sm:$0xff] %vm20_vm0, %v595_v61  ;;  %v565_v9 = vadd.f32 %v427_v4, %v99_v58  ;;  %v597_v10 = vadd.f32 %v507_v5, %v131_v59  ;;  %v107_v61 = vld [vmem:[#allocation2 + $0xb8] sm:$0xff] }
 0x102   :  { %v798_v8 = vadd.f32 %v1361_v50, %v722_v3  ;;  %v692_v13 = vld [vmem:[#allocation2 + $0x58] sm:$0xff]  ;;  %v105_v53 = vld [vmem:[#allocation2 + $0xa8] sm:$0xff] }
 0x103   :  { %v724_v14 = vld [vmem:[#allocation2 + $0x158] sm:$0xff]  ;;  %v1128_v15 = vpack.c.bf16 %v766_v6, %v765_v0  ;;  %v768_v17 = vadd.f32 %v1361_v50, %v692_v13  ;;  %629 = vst.msk [vmem:[#allocation2 + $0x78] sm:$0xff] %vm20_vm0, %v565_v9  ;;  %661 = vst.msk [vmem:[#allocation2 + $0x178] sm:$0xff] %vm20_vm0, %v597_v10 }
 0x104   :  { %v1144_v16 = vpack.c.bf16 %v798_v8, %v797_v1  ;;  %v800_v18 = vadd.f32 %v1361_v50, %v724_v14 }
 0x105   :  { %1020 = vst.msk [vmem:[%s1624_s3 + $0x20] sm:$0xff] %vm1371_vm3, %v1128_v15  ;;  %v1129_v21 = vpack.c.bf16 %v768_v17, %v767_v11  ;;  %v431_v23 = vpop.f32.mrb[16].mxu0  ;;  %v511_v24 = vpop.f32.mrb[16].mxu1 }
 0x106   :  { %1036 = vst.msk [vmem:[%s1624_s3 + $0xa0] sm:$0xff] %vm1371_vm3, %v1144_v16  ;;  %v1145_v22 = vpack.c.bf16 %v800_v18, %v799_v12  ;;  %v433_v25 = vpop.f32.mrb[17].mxu0  ;;  %v513_v26 = vpop.f32.mrb[17].mxu1  ;;  %v773_v3 = vadd.f32 %v1359_v47, %v431_v23  ;;  %v805_v4 = vadd.f32 %v1359_v47, %v511_v24  ;;  %v141_v23 = vld [vmem:[#allocation2 + $0x1c8] sm:$0xff] }
 0x107   :  { %1021 = vst.msk [vmem:[%s1624_s3 + $0x28] sm:$0xff] %vm1371_vm3, %v1129_v21  ;;  %v567_v29 = vadd.f32 %v433_v25, %v101_v19  ;;  %v599_v30 = vadd.f32 %v513_v26, %v133_v20  ;;  %v435_v31 = vpop.f32.mrb[18].mxu0  ;;  %v515_v32 = vpop.f32.mrb[18].mxu1 }
 0x108   :  { %1037 = vst.msk [vmem:[%s1624_s3 + $0xa8] sm:$0xff] %vm1371_vm3, %v1145_v22  ;;  %v694_v35 = vld [vmem:[#allocation2 + $0x68] sm:$0xff]  ;;  %v437_v37 = vpop.f32.mrb[19].mxu0  ;;  %v517_v38 = vpop.f32.mrb[19].mxu1  ;;  %v775_v14 = vadd.f32 %v1359_v47, %v435_v31  ;;  %v807_v15 = vadd.f32 %v1359_v47, %v515_v32  ;;  %v143_v31 = vld [vmem:[#allocation2 + $0x1d8] sm:$0xff] }
 0x109   :  { %v726_v36 = vld [vmem:[#allocation2 + $0x168] sm:$0xff]  ;;  %v770_v39 = vadd.f32 %v1361_v50, %v694_v35  ;;  %631 = vst.msk [vmem:[#allocation2 + $0x88] sm:$0xff] %vm20_vm0, %v567_v29  ;;  %663 = vst.msk [vmem:[#allocation2 + $0x188] sm:$0xff] %vm20_vm0, %v599_v30  ;;  %v569_v41 = vadd.f32 %v437_v37, %v103_v27  ;;  %v601_v42 = vadd.f32 %v517_v38, %v135_v28  ;;  %v111_v30 = vld [vmem:[#allocation2 + $0xd8] sm:$0xff] }
 0x10a   :  { %v802_v40 = vadd.f32 %v1361_v50, %v726_v36  ;;  %v696_v45 = vld [vmem:[#allocation2 + $0x78] sm:$0xff]  ;;  %v109_v22 = vld [vmem:[#allocation2 + $0xc8] sm:$0xff] }
 0x10b   :  { %v728_v46 = vld [vmem:[#allocation2 + $0x178] sm:$0xff]  ;;  %v1130_v48 = vpack.c.bf16 %v770_v39, %v769_v33  ;;  %v772_v51 = vadd.f32 %v1361_v50, %v696_v45  ;;  %633 = vst.msk [vmem:[#allocation2 + $0x98] sm:$0xff] %vm20_vm0, %v569_v41  ;;  %665 = vst.msk [vmem:[#allocation2 + $0x198] sm:$0xff] %vm20_vm0, %v601_v42 }
 0x10c   :  { %v1146_v49 = vpack.c.bf16 %v802_v40, %v801_v34  ;;  %v804_v52 = vadd.f32 %v1361_v50, %v728_v46 }
 0x10d   :  { %1022 = vst.msk [vmem:[%s1624_s3 + $0x30] sm:$0xff] %vm1371_vm3, %v1130_v48  ;;  %v1131_v55 = vpack.c.bf16 %v772_v51, %v771_v43  ;;  %v441_v57 = vpop.f32.mrb[20].mxu0  ;;  %v521_v58 = vpop.f32.mrb[20].mxu1 }
 0x10e   :  { %1038 = vst.msk [vmem:[%s1624_s3 + $0xb0] sm:$0xff] %vm1371_vm3, %v1146_v49  ;;  %v1147_v56 = vpack.c.bf16 %v804_v52, %v803_v44  ;;  %v443_v59 = vpop.f32.mrb[21].mxu0  ;;  %v523_v60 = vpop.f32.mrb[21].mxu1  ;;  %v777_v36 = vadd.f32 %v1359_v47, %v441_v57  ;;  %v809_v37 = vadd.f32 %v1359_v47, %v521_v58  ;;  %v145_v57 = vld [vmem:[#allocation2 + $0x1e8] sm:$0xff] }
 0x10f   :  { %1023 = vst.msk [vmem:[%s1624_s3 + $0x38] sm:$0xff] %vm1371_vm3, %v1131_v55  ;;  %v571_v63 = vadd.f32 %v443_v59, %v105_v53  ;;  %v603_v0 = vadd.f32 %v523_v60, %v137_v54  ;;  %v445_v1 = vpop.f32.mrb[22].mxu0  ;;  %v525_v2 = vpop.f32.mrb[22].mxu1 }
 0x110   :  { %1039 = vst.msk [vmem:[%s1624_s3 + $0xb8] sm:$0xff] %vm1371_vm3, %v1147_v56  ;;  %v698_v5 = vld [vmem:[#allocation2 + $0x88] sm:$0xff]  ;;  %v447_v8 = vpop.f32.mrb[23].mxu0  ;;  %v527_v9 = vpop.f32.mrb[23].mxu1  ;;  %v779_v46 = vadd.f32 %v1359_v47, %v445_v1  ;;  %v811_v48 = vadd.f32 %v1359_v47, %v525_v2  ;;  %v147_v1 = vld [vmem:[#allocation2 + $0x1f8] sm:$0xff] }
 0x111   :  { %v730_v6 = vld [vmem:[#allocation2 + $0x188] sm:$0xff]  ;;  %v774_v10 = vadd.f32 %v1361_v50, %v698_v5  ;;  %635 = vst.msk [vmem:[#allocation2 + $0xa8] sm:$0xff] %vm20_vm0, %v571_v63  ;;  %667 = vst.msk [vmem:[#allocation2 + $0x1a8] sm:$0xff] %vm20_vm0, %v603_v0  ;;  %v573_v12 = vadd.f32 %v447_v8, %v107_v61  ;;  %v605_v13 = vadd.f32 %v527_v9, %v139_v62  ;;  %v115_v0 = vld [vmem:[#allocation2 + $0xf8] sm:$0xff] }
 0x112   :  { %v806_v11 = vadd.f32 %v1361_v50, %v730_v6  ;;  %v700_v16 = vld [vmem:[#allocation2 + $0x98] sm:$0xff]  ;;  %v113_v56 = vld [vmem:[#allocation2 + $0xe8] sm:$0xff] }
 0x113   :  { %v732_v17 = vld [vmem:[#allocation2 + $0x198] sm:$0xff]  ;;  %v1132_v18 = vpack.c.bf16 %v774_v10, %v773_v3  ;;  %v776_v20 = vadd.f32 %v1361_v50, %v700_v16  ;;  %637 = vst.msk [vmem:[#allocation2 + $0xb8] sm:$0xff] %vm20_vm0, %v573_v12  ;;  %669 = vst.msk [vmem:[#allocation2 + $0x1b8] sm:$0xff] %vm20_vm0, %v605_v13 }
 0x114   :  { %v1148_v19 = vpack.c.bf16 %v806_v11, %v805_v4  ;;  %v808_v21 = vadd.f32 %v1361_v50, %v732_v17 }
 0x115   :  { %1024 = vst.msk [vmem:[%s1624_s3 + $0x40] sm:$0xff] %vm1371_vm3, %v1132_v18  ;;  %v1133_v24 = vpack.c.bf16 %v776_v20, %v775_v14  ;;  %v451_v26 = vpop.f32.mrb[24].mxu0  ;;  %v531_v27 = vpop.f32.mrb[24].mxu1 }
 0x116   :  { %1040 = vst.msk [vmem:[%s1624_s3 + $0xc0] sm:$0xff] %vm1371_vm3, %v1148_v19  ;;  %v1149_v25 = vpack.c.bf16 %v808_v21, %v807_v15  ;;  %v453_v28 = vpop.f32.mrb[25].mxu0  ;;  %v533_v29 = vpop.f32.mrb[25].mxu1  ;;  %v781_v6 = vadd.f32 %v1359_v47, %v451_v26  ;;  %v813_v8 = vadd.f32 %v1359_v47, %v531_v27 }
 0x117   :  { %1025 = vst.msk [vmem:[%s1624_s3 + $0x48] sm:$0xff] %vm1371_vm3, %v1133_v24  ;;  %v575_v32 = vadd.f32 %v453_v28, %v109_v22  ;;  %v607_v33 = vadd.f32 %v533_v29, %v141_v23  ;;  %v455_v34 = vpop.f32.mrb[26].mxu0  ;;  %v535_v35 = vpop.f32.mrb[26].mxu1 }
 0x118   :  { %1041 = vst.msk [vmem:[%s1624_s3 + $0xc8] sm:$0xff] %vm1371_vm3, %v1149_v25  ;;  %v702_v38 = vld [vmem:[#allocation2 + $0xa8] sm:$0xff]  ;;  %v457_v40 = vpop.f32.mrb[27].mxu0  ;;  %v537_v41 = vpop.f32.mrb[27].mxu1  ;;  %v783_v17 = vadd.f32 %v1359_v47, %v455_v34  ;;  %v815_v18 = vadd.f32 %v1359_v47, %v535_v35 }
 0x119   :  { %v734_v39 = vld [vmem:[#allocation2 + $0x1a8] sm:$0xff]  ;;  %v778_v42 = vadd.f32 %v1361_v50, %v702_v38  ;;  %639 = vst.msk [vmem:[#allocation2 + $0xc8] sm:$0xff] %vm20_vm0, %v575_v32  ;;  %671 = vst.msk [vmem:[#allocation2 + $0x1c8] sm:$0xff] %vm20_vm0, %v607_v33  ;;  %v577_v44 = vadd.f32 %v457_v40, %v111_v30  ;;  %v609_v45 = vadd.f32 %v537_v41, %v143_v31 }
 0x11a   :  { %v810_v43 = vadd.f32 %v1361_v50, %v734_v39  ;;  %v704_v49 = vld [vmem:[#allocation2 + $0xb8] sm:$0xff] }
 0x11b   :  { %v736_v51 = vld [vmem:[#allocation2 + $0x1b8] sm:$0xff]  ;;  %v1134_v52 = vpack.c.bf16 %v778_v42, %v777_v36  ;;  %v780_v54 = vadd.f32 %v1361_v50, %v704_v49  ;;  %641 = vst.msk [vmem:[#allocation2 + $0xd8] sm:$0xff] %vm20_vm0, %v577_v44  ;;  %673 = vst.msk [vmem:[#allocation2 + $0x1d8] sm:$0xff] %vm20_vm0, %v609_v45 }
 0x11c   :  { %v1150_v53 = vpack.c.bf16 %v810_v43, %v809_v37  ;;  %v812_v55 = vadd.f32 %v1361_v50, %v736_v51 }
 0x11d   :  { %1026 = vst.msk [vmem:[%s1624_s3 + $0x50] sm:$0xff] %vm1371_vm3, %v1134_v52  ;;  %v1135_v58 = vpack.c.bf16 %v780_v54, %v779_v46  ;;  %v461_v60 = vpop.f32.mrb[28].mxu0  ;;  %v541_v61 = vpop.f32.mrb[28].mxu1 }
 0x11e   :  { %1042 = vst.msk [vmem:[%s1624_s3 + $0xd0] sm:$0xff] %vm1371_vm3, %v1150_v53  ;;  %v1151_v59 = vpack.c.bf16 %v812_v55, %v811_v48  ;;  %v463_v62 = vpop.f32.mrb[29].mxu0  ;;  %v543_v63 = vpop.f32.mrb[29].mxu1  ;;  %v785_v29 = vadd.f32 %v1359_v47, %v461_v60  ;;  %v817_v30 = vadd.f32 %v1359_v47, %v541_v61 }
 0x11f   :  { %1027 = vst.msk [vmem:[%s1624_s3 + $0x58] sm:$0xff] %vm1371_vm3, %v1135_v58  ;;  %v579_v2 = vadd.f32 %v463_v62, %v113_v56  ;;  %v611_v3 = vadd.f32 %v543_v63, %v145_v57  ;;  %v465_v4 = vpop.f32.mrb[30].mxu0  ;;  %v545_v5 = vpop.f32.mrb[30].mxu1 }
 0x120   :  { %1043 = vst.msk [vmem:[%s1624_s3 + $0xd8] sm:$0xff] %vm1371_vm3, %v1151_v59  ;;  %v706_v9 = vld [vmem:[#allocation2 + $0xc8] sm:$0xff]  ;;  %v467_v11 = vpop.f32.mrb[31].mxu0  ;;  %v547_v12 = vpop.f32.mrb[31].mxu1  ;;  %v787_v33 = vadd.f32 %v1359_v47, %v465_v4  ;;  %v819_v34 = vadd.f32 %v1359_v47, %v545_v5 }
 0x121   :  { %v738_v10 = vld [vmem:[#allocation2 + $0x1c8] sm:$0xff]  ;;  %v782_v13 = vadd.f32 %v1361_v50, %v706_v9  ;;  %643 = vst.msk [vmem:[#allocation2 + $0xe8] sm:$0xff] %vm20_vm0, %v579_v2  ;;  %675 = vst.msk [vmem:[#allocation2 + $0x1e8] sm:$0xff] %vm20_vm0, %v611_v3  ;;  %v581_v15 = vadd.f32 %v467_v11, %v115_v0  ;;  %v613_v16 = vadd.f32 %v547_v12, %v147_v1 }
 0x122   :  { %v814_v14 = vadd.f32 %v1361_v50, %v738_v10  ;;  %v708_v19 = vld [vmem:[#allocation2 + $0xd8] sm:$0xff] }
 0x123   :  { %v740_v20 = vld [vmem:[#allocation2 + $0x1d8] sm:$0xff]  ;;  %v1136_v21 = vpack.c.bf16 %v782_v13, %v781_v6  ;;  %v784_v23 = vadd.f32 %v1361_v50, %v708_v19  ;;  %645 = vst.msk [vmem:[#allocation2 + $0xf8] sm:$0xff] %vm20_vm0, %v581_v15  ;;  %677 = vst.msk [vmem:[#allocation2 + $0x1f8] sm:$0xff] %vm20_vm0, %v613_v16 }
 0x124   :  { %v1152_v22 = vpack.c.bf16 %v814_v14, %v813_v8  ;;  %v816_v24 = vadd.f32 %v1361_v50, %v740_v20 }
 0x125   :  { %1028 = vst.msk [vmem:[%s1624_s3 + $0x60] sm:$0xff] %vm1371_vm3, %v1136_v21  ;;  %v1137_v25 = vpack.c.bf16 %v784_v23, %v783_v17 }
 0x126   :  { %1044 = vst.msk [vmem:[%s1624_s3 + $0xe0] sm:$0xff] %vm1371_vm3, %v1152_v22  ;;  %v1153_v26 = vpack.c.bf16 %v816_v24, %v815_v18 }
 0x127   :  { %1029 = vst.msk [vmem:[%s1624_s3 + $0x68] sm:$0xff] %vm1371_vm3, %v1137_v25 }
 0x128   :  { %1045 = vst.msk [vmem:[%s1624_s3 + $0xe8] sm:$0xff] %vm1371_vm3, %v1153_v26  ;;  %v710_v27 = vld [vmem:[#allocation2 + $0xe8] sm:$0xff] }
 0x129   :  { %v742_v28 = vld [vmem:[#allocation2 + $0x1e8] sm:$0xff]  ;;  %v786_v31 = vadd.f32 %v1361_v50, %v710_v27 }
 0x12a   :  { %v818_v32 = vadd.f32 %v1361_v50, %v742_v28  ;;  %v712_v35 = vld [vmem:[#allocation2 + $0xf8] sm:$0xff] }
 0x12b   :  { %v744_v36 = vld [vmem:[#allocation2 + $0x1f8] sm:$0xff]  ;;  %v1138_v37 = vpack.c.bf16 %v786_v31, %v785_v29  ;;  %v788_v39 = vadd.f32 %v1361_v50, %v712_v35 }
 0x12c   :  { %v1154_v38 = vpack.c.bf16 %v818_v32, %v817_v30  ;;  %v820_v40 = vadd.f32 %v1361_v50, %v744_v36 }
 0x12d   :  { %1030 = vst.msk [vmem:[%s1624_s3 + $0x70] sm:$0xff] %vm1371_vm3, %v1138_v37  ;;  %v1139_v47 = vpack.c.bf16 %v788_v39, %v787_v33 }
 0x12e   :  { %1046 = vst.msk [vmem:[%s1624_s3 + $0xf0] sm:$0xff] %vm1371_vm3, %v1154_v38  ;;  %v1155_v41 = vpack.c.bf16 %v820_v40, %v819_v34 }
 0x12f   :  { %1031 = vst.msk [vmem:[%s1624_s3 + $0x78] sm:$0xff] %vm1371_vm3, %v1139_v47 }
 0x130   :  { %1047 = vst.msk [vmem:[%s1624_s3 + $0xf8] sm:$0xff] %vm1371_vm3, %v1155_v41 }

</bundles_post_ra>
